<compile_context>
chip_gen: v6e
topology: v6e:2x2x1
jax: 0.10.0
libtpu: 0.0.40
codegen_flags: <defaults>
</compile_context>

<pallas_src>
import jax
import jax.numpy as jnp
from jax import lax
from jax.experimental import pallas as pl
from jax.experimental.pallas import tpu as pltpu

N_USERS = 15400
N_ITEMS = 1000
N_DATA = 2

LANES = 128      # low 7 index bits -> table column
ROWS_U = 128     # user table rows  (128 * 128 = 16384 >= 15400)
ROWS_I = 8       # item table rows  (  8 * 128 =  1024 >= 1000)
TB_MAX = 1024    # max batch lanes per grid step


def weight_network_kernel(idx_ref, uhi_ref, ulo_ref, ihi_ref, ilo_ref,
                          db_ref, out_ref):
    """One batch tile: gather user/item bias via one-hot MXU matmuls, add the
    SMEM data-bias scalar, exp((sum)/5).  Batch lives on the lane axis."""
    TB = out_ref.shape[-1]

    idx = idx_ref[...]                 # (8, TB) int32; rows 0..2 used
    uid = idx[0:1, :]
    iid = idx[1:2, :]
    did = idx[2:3, :]

    # Shared sublane iota, built once and sliced for both gathers.
    sub_iota = lax.broadcasted_iota(jnp.int32, (ROWS_U, TB), 0)   # (128, TB)

    def gather(i, hi_ref, lo_ref):
        nrows = hi_ref.shape[1]                    # static: 128 (user) / 8 (item)
        row = i >> 7                               # (1, TB)
        col = i & (LANES - 1)                      # (1, TB)
        onehot = (sub_iota[:nrows, :] == row).astype(jnp.bfloat16)  # (nrows, TB)
        # rowsel[c, b] = table[row[b]*128 + c]; hi/lo bf16 split keeps f32 accuracy
        rowsel = (jnp.dot(hi_ref[...], onehot, preferred_element_type=jnp.float32)
                  + jnp.dot(lo_ref[...], onehot, preferred_element_type=jnp.float32))
        picked = jnp.where(sub_iota == col, rowsel, 0.0)             # (128, TB)
        return jnp.sum(picked, axis=0, keepdims=True)                # (1, TB)

    u = gather(uid, uhi_ref, ulo_ref)
    i = gather(iid, ihi_ref, ilo_ref)
    d = jnp.where(did == 0, db_ref[0], db_ref[1])  # (1, TB) f32, scalar select

    # exp goes to the EUP slot; /5 folds to a multiply.
    out_ref[...] = jnp.exp((u + i + d) * 0.2)


def _round_up(n, m):
    return ((n + m - 1) // m) * m


def _choose_tile(batch):
    """Batch lanes per grid step: wide enough to amortize per-step overhead,
    but keep >= 2 grid steps for larger batches (v7x has two TensorCores)."""
    if batch <= LANES:
        return LANES
    half = _round_up((batch + 1) // 2, LANES)
    return min(TB_MAX, half)


def prepare_weight_network_params(user_bias, item_bias, data_bias):
    """One-time prep (hoisted out of the forward hot path): flatten each bias
    table, zero-pad, store TRANSPOSED as (LANES, ROWS), and split into hi/lo
    bf16 halves for single-pass MXU matmuls."""
    def split(tab, rows):
        flat = tab.reshape(-1).astype(jnp.float32)
        flat = jnp.pad(flat, (0, rows * LANES - flat.shape[0]))
        t = flat.reshape(rows, LANES).T                    # (LANES, rows) f32
        hi = t.astype(jnp.bfloat16)
        lo = (t - hi.astype(jnp.float32)).astype(jnp.bfloat16)
        return hi, lo

    u_hi, u_lo = split(user_bias, ROWS_U)
    i_hi, i_lo = split(item_bias, ROWS_I)
    return {
        "user_hi": u_hi, "user_lo": u_lo,
        "item_hi": i_hi, "item_lo": i_lo,
        "data_b": data_bias.reshape(-1).astype(jnp.float32),   # (2,) -> SMEM
    }


def weight_network_apply(params, x, obs_rew):
    """
    params:   output of prepare_weight_network_params
    x:        (B, 2) int   — [:, 0] = user index, [:, 1] = item index
    obs_rew:  (B,)         — cast to int, selects data_bias[0] / data_bias[1]
    returns:  (B, 1) float32 = exp((u_bias + i_bias + d_bias) / 5)
    """
    B = x.shape[0]
    TB = _choose_tile(B)
    G = -(-B // TB)
    total = G * TB
    pad_b = total - B

    def pad(v):
        v = v.astype(jnp.int32).reshape(-1)
        return jnp.pad(v, (0, pad_b))        # padded slots use valid index 0

    # Pack uid/iid/did into one (G, 8, TB) int32 block -> one DMA per step.
    stacked = jnp.stack([pad(x[:, 0]), pad(x[:, 1]), pad(obs_rew)], axis=0)
    idx = stacked.reshape(3, G, TB).transpose(1, 0, 2)      # (G, 3, TB)
    idx = jnp.pad(idx, ((0, 0), (0, 5), (0, 0)))            # (G, 8, TB)

    idx_spec = pl.BlockSpec((None, 8, TB), lambda g: (g, 0, 0))
    utab_spec = pl.BlockSpec((LANES, ROWS_U), lambda g: (0, 0))
    itab_spec = pl.BlockSpec((LANES, ROWS_I), lambda g: (0, 0))
    smem_spec = pl.BlockSpec(memory_space=pltpu.MemorySpace.SMEM)

    out = pl.pallas_call(
        weight_network_kernel,
        out_shape=jax.ShapeDtypeStruct((G, 1, TB), jnp.float32),
        grid=(G,),
        in_specs=[idx_spec, utab_spec, utab_spec, itab_spec, itab_spec, smem_spec],
        out_specs=pl.BlockSpec((None, 1, TB), lambda g: (g, 0, 0)),
        compiler_params=pltpu.CompilerParams(
            dimension_semantics=("parallel",)),
    )(idx, params["user_hi"], params["user_lo"],
      params["item_hi"], params["item_lo"], params["data_b"])

    # Lane-dense (G, 1, TB) -> PyTorch-shaped (B, 1).
    return out.reshape(total)[:B].reshape(B, 1)


def weight_network(x, obs_rew, user_bias, item_bias, data_bias):
    """Convenience wrapper: prep + apply (prefer prepping once and reusing)."""
    params = prepare_weight_network_params(user_bias, item_bias, data_bias)
    return weight_network_apply(params, x, obs_rew)


def _reference(x, obs_rew, user_bias, item_bias, data_bias):
    return jnp.exp((user_bias[x[:, 0]] + item_bias[x[:, 1]]
                    + data_bias[obs_rew.astype(jnp.int32)]) / 5.0)


if __name__ == "__main__":
    key = jax.random.PRNGKey(0)
    k_u, k_i, k_d, k_xu, k_xi, k_r = jax.random.split(key, 6)

    # Deterministic "parameters" (nn.Embedding default init ~ N(0, 1)).
    user_bias = jax.random.normal(k_u, (N_USERS, 1), dtype=jnp.float32)
    item_bias = jax.random.normal(k_i, (N_ITEMS, 1), dtype=jnp.float32)
    data_bias = jax.random.normal(k_d, (N_DATA, 1), dtype=jnp.float32)

    # Table prep happens once, outside the per-call hot path.
    params = prepare_weight_network_params(user_bias, item_bias, data_bias)

    # Check 1: small batch, single grid step.
    B = 8
    x_u = jax.random.randint(k_xu, (B,), 0, N_USERS, dtype=jnp.int32)
    x_i = jax.random.randint(k_xi, (B,), 0, N_ITEMS, dtype=jnp.int32)
    x = jnp.stack([x_u, x_i], axis=1)                       # (B, 2)
    obs_rew = jax.random.randint(k_r, (B,), 0, N_DATA, dtype=jnp.int32)

    out = jax.block_until_ready(weight_network_apply(params, x, obs_rew))
    ref = _reference(x, obs_rew, user_bias, item_bias, data_bias)
    assert out.shape == (B, 1)
    assert jnp.allclose(out, ref, rtol=1e-4, atol=1e-4)

    # Check 2: batch not a multiple of 128, spanning multiple parallel steps.
    B2 = 200
    k2u, k2i, k2r = jax.random.split(jax.random.PRNGKey(1), 3)
    x2 = jnp.stack([jax.random.randint(k2u, (B2,), 0, N_USERS, dtype=jnp.int32),
                    jax.random.randint(k2i, (B2,), 0, N_ITEMS, dtype=jnp.int32)],
                   axis=1)
    obs2 = jax.random.randint(k2r, (B2,), 0, N_DATA, dtype=jnp.int32)
    out2 = jax.block_until_ready(weight_network_apply(params, x2, obs2))
    ref2 = _reference(x2, obs2, user_bias, item_bias, data_bias)
    assert out2.shape == (B2, 1)
    assert jnp.allclose(out2, ref2, rtol=1e-4, atol=1e-4)

    print("KERNEL_OK")
</pallas_src>

<mosaic_0001>
module attributes {stable_mosaic.version = 11 : i64} {
  func.func @weight_network_kernel(%arg0: i32, %arg1: memref<1x8x128xi32, #tpu.memory_space<vmem>>, %arg2: memref<128x128xbf16, #tpu.memory_space<vmem>>, %arg3: memref<128x128xbf16, #tpu.memory_space<vmem>>, %arg4: memref<128x8xbf16, #tpu.memory_space<vmem>>, %arg5: memref<128x8xbf16, #tpu.memory_space<vmem>>, %arg6: memref<2xf32, #tpu.memory_space<smem>>, %arg7: memref<1x1x128xf32, #tpu.memory_space<vmem>>) attributes {dimension_semantics = [#tpu.dimension_semantics<parallel>], iteration_bounds = array<i64: 1>, scalar_prefetch = 0 : i64, scratch_operands = 0 : i64, tpu.core_type = #tpu.core_type<tc>, window_params = [{transform_indices = @transform_0, window_bounds = array<i64: 1, 8, 128>}, {pipeline_mode = #tpu.pipeline_mode<synchronous>, transform_indices = @transform_1, window_bounds = array<i64: 128, 128>}, {pipeline_mode = #tpu.pipeline_mode<synchronous>, transform_indices = @transform_2, window_bounds = array<i64: 128, 128>}, {pipeline_mode = #tpu.pipeline_mode<synchronous>, transform_indices = @transform_3, window_bounds = array<i64: 128, 8>}, {pipeline_mode = #tpu.pipeline_mode<synchronous>, transform_indices = @transform_4, window_bounds = array<i64: 128, 8>}, {transform_indices = @transform_5, window_bounds = array<i64: 2>}, {transform_indices = @transform_6, window_bounds = array<i64: 1, 1, 128>}]} {
    %c0 = arith.constant 0 : index
    %c0_0 = arith.constant 0 : index
    %c0_1 = arith.constant 0 : index
    %0 = vector.load %arg1[%c0, %c0_0, %c0_1] : memref<1x8x128xi32, #tpu.memory_space<vmem>>, vector<1x8x128xi32>
    %1 = vector.shape_cast %0 : vector<1x8x128xi32> to vector<8x128xi32>
    %2 = vector.extract_strided_slice %1 {offsets = [0, 0], sizes = [1, 128], strides = [1, 1]} : vector<8x128xi32> to vector<1x128xi32>
    %3 = vector.extract_strided_slice %1 {offsets = [1, 0], sizes = [1, 128], strides = [1, 1]} : vector<8x128xi32> to vector<1x128xi32>
    %4 = vector.extract_strided_slice %1 {offsets = [2, 0], sizes = [1, 128], strides = [1, 1]} : vector<8x128xi32> to vector<1x128xi32>
    %5 = tpu.iota {dimensions = array<i32: 0>} : vector<128x128xi32>
    %c7_i32 = arith.constant 7 : i32
    %6 = vector.broadcast %c7_i32 : i32 to vector<1x128xi32>
    %7 = arith.shrsi %2, %6 : vector<1x128xi32>
    %c127_i32 = arith.constant 127 : i32
    %8 = vector.broadcast %c127_i32 : i32 to vector<1x128xi32>
    %9 = arith.andi %2, %8 : vector<1x128xi32>
    %10 = vector.broadcast %7 : vector<1x128xi32> to vector<128x128xi32>
    %11 = arith.cmpi eq, %5, %10 : vector<128x128xi32>
    %12 = arith.extui %11 : vector<128x128xi1> to vector<128x128xi32>
    %13 = arith.sitofp %12 : vector<128x128xi32> to vector<128x128xf32>
    %14 = arith.truncf %13 : vector<128x128xf32> to vector<128x128xbf16>
    %c0_2 = arith.constant 0 : index
    %c0_3 = arith.constant 0 : index
    %15 = vector.load %arg2[%c0_2, %c0_3] : memref<128x128xbf16, #tpu.memory_space<vmem>>, vector<128x128xbf16>
    %cst = arith.constant dense<0.000000e+00> : vector<128x128xf32>
    %16 = tpu.matmul %15, %14, %cst {dimension_numbers = #tpu.dot_dimension_numbers<[1], [0], [0], [1], [0, 0, 1, 1], [], []>} : vector<128x128xbf16>, vector<128x128xbf16>, vector<128x128xf32> -> vector<128x128xf32>
    %c0_4 = arith.constant 0 : index
    %c0_5 = arith.constant 0 : index
    %17 = vector.load %arg3[%c0_4, %c0_5] : memref<128x128xbf16, #tpu.memory_space<vmem>>, vector<128x128xbf16>
    %cst_6 = arith.constant dense<0.000000e+00> : vector<128x128xf32>
    %18 = tpu.matmul %17, %14, %cst_6 {dimension_numbers = #tpu.dot_dimension_numbers<[1], [0], [0], [1], [0, 0, 1, 1], [], []>} : vector<128x128xbf16>, vector<128x128xbf16>, vector<128x128xf32> -> vector<128x128xf32>
    %19 = arith.addf %16, %18 : vector<128x128xf32>
    %20 = vector.broadcast %9 : vector<1x128xi32> to vector<128x128xi32>
    %21 = arith.cmpi eq, %5, %20 : vector<128x128xi32>
    %cst_7 = arith.constant 0.000000e+00 : f32
    %22 = vector.broadcast %cst_7 : f32 to vector<128x128xf32>
    %23 = arith.select %21, %19, %22 : vector<128x128xi1>, vector<128x128xf32>
    %cst_8 = arith.constant dense<0.000000e+00> : vector<128xf32>
    %24 = vector.multi_reduction <add>, %23, %cst_8 [0] : vector<128x128xf32> to vector<128xf32>
    %25 = vector.shape_cast %24 : vector<128xf32> to vector<1x128xf32>
    %c7_i32_9 = arith.constant 7 : i32
    %26 = vector.broadcast %c7_i32_9 : i32 to vector<1x128xi32>
    %27 = arith.shrsi %3, %26 : vector<1x128xi32>
    %c127_i32_10 = arith.constant 127 : i32
    %28 = vector.broadcast %c127_i32_10 : i32 to vector<1x128xi32>
    %29 = arith.andi %3, %28 : vector<1x128xi32>
    %30 = vector.extract_strided_slice %5 {offsets = [0, 0], sizes = [8, 128], strides = [1, 1]} : vector<128x128xi32> to vector<8x128xi32>
    %31 = vector.broadcast %27 : vector<1x128xi32> to vector<8x128xi32>
    %32 = arith.cmpi eq, %30, %31 : vector<8x128xi32>
    %33 = arith.extui %32 : vector<8x128xi1> to vector<8x128xi32>
    %34 = arith.sitofp %33 : vector<8x128xi32> to vector<8x128xf32>
    %35 = arith.truncf %34 : vector<8x128xf32> to vector<8x128xbf16>
    %c0_11 = arith.constant 0 : index
    %c0_12 = arith.constant 0 : index
    %36 = vector.load %arg4[%c0_11, %c0_12] : memref<128x8xbf16, #tpu.memory_space<vmem>>, vector<128x8xbf16>
    %cst_13 = arith.constant dense<0.000000e+00> : vector<128x128xf32>
    %37 = tpu.matmul %36, %35, %cst_13 {dimension_numbers = #tpu.dot_dimension_numbers<[1], [0], [0], [1], [0, 0, 1, 1], [], []>} : vector<128x8xbf16>, vector<8x128xbf16>, vector<128x128xf32> -> vector<128x128xf32>
    %c0_14 = arith.constant 0 : index
    %c0_15 = arith.constant 0 : index
    %38 = vector.load %arg5[%c0_14, %c0_15] : memref<128x8xbf16, #tpu.memory_space<vmem>>, vector<128x8xbf16>
    %cst_16 = arith.constant dense<0.000000e+00> : vector<128x128xf32>
    %39 = tpu.matmul %38, %35, %cst_16 {dimension_numbers = #tpu.dot_dimension_numbers<[1], [0], [0], [1], [0, 0, 1, 1], [], []>} : vector<128x8xbf16>, vector<8x128xbf16>, vector<128x128xf32> -> vector<128x128xf32>
    %40 = arith.addf %37, %39 : vector<128x128xf32>
    %41 = vector.broadcast %29 : vector<1x128xi32> to vector<128x128xi32>
    %42 = arith.cmpi eq, %5, %41 : vector<128x128xi32>
    %cst_17 = arith.constant 0.000000e+00 : f32
    %43 = vector.broadcast %cst_17 : f32 to vector<128x128xf32>
    %44 = arith.select %42, %40, %43 : vector<128x128xi1>, vector<128x128xf32>
    %cst_18 = arith.constant dense<0.000000e+00> : vector<128xf32>
    %45 = vector.multi_reduction <add>, %44, %cst_18 [0] : vector<128x128xf32> to vector<128xf32>
    %46 = vector.shape_cast %45 : vector<128xf32> to vector<1x128xf32>
    %c0_i32 = arith.constant 0 : i32
    %47 = vector.broadcast %c0_i32 : i32 to vector<1x128xi32>
    %48 = arith.cmpi eq, %4, %47 : vector<1x128xi32>
    %c0_19 = arith.constant 0 : index
    %49 = memref.load %arg6[%c0_19] : memref<2xf32, #tpu.memory_space<smem>>
    %c1 = arith.constant 1 : index
    %50 = memref.load %arg6[%c1] : memref<2xf32, #tpu.memory_space<smem>>
    %51 = vector.broadcast %49 : f32 to vector<1x128xf32>
    %52 = vector.broadcast %50 : f32 to vector<1x128xf32>
    %53 = arith.select %48, %51, %52 : vector<1x128xi1>, vector<1x128xf32>
    %54 = arith.addf %25, %46 : vector<1x128xf32>
    %55 = arith.addf %54, %53 : vector<1x128xf32>
    %cst_20 = arith.constant 2.000000e-01 : f32
    %56 = vector.broadcast %cst_20 : f32 to vector<1x128xf32>
    %57 = arith.mulf %55, %56 : vector<1x128xf32>
    %58 = math.exp %57 : vector<1x128xf32>
    %c0_21 = arith.constant 0 : index
    %c0_22 = arith.constant 0 : index
    %c0_23 = arith.constant 0 : index
    %59 = vector.load %arg7[%c0_21, %c0_22, %c0_23] : memref<1x1x128xf32, #tpu.memory_space<vmem>>, vector<1x1x128xf32>
    %60 = vector.shape_cast %59 : vector<1x1x128xf32> to vector<1x128xf32>
    %61 = vector.shape_cast %58 : vector<1x128xf32> to vector<1x1x128xf32>
    tpu.vector_store %arg7[%c0_21, %c0_22, %c0_23], %61 {strides = array<i32>} : memref<1x1x128xf32, #tpu.memory_space<vmem>>, vector<1x1x128xf32>,
    return
  }
  func.func @transform_0(%arg0: i32) -> (i32, i32, i32) {
    %c0_i32 = arith.constant 0 : i32
    %c0_i32_0 = arith.constant 0 : i32
    %c0_i32_1 = arith.constant 0 : i32
    return %arg0, %c0_i32, %c0_i32_0 : i32, i32, i32
  }
  func.func @transform_1(%arg0: i32) -> (i32, i32) {
    %c0_i32 = arith.constant 0 : i32
    %c0_i32_0 = arith.constant 0 : i32
    %c0_i32_1 = arith.constant 0 : i32
    return %c0_i32, %c0_i32_0 : i32, i32
  }
  func.func @transform_2(%arg0: i32) -> (i32, i32) {
    %c0_i32 = arith.constant 0 : i32
    %c0_i32_0 = arith.constant 0 : i32
    %c0_i32_1 = arith.constant 0 : i32
    return %c0_i32, %c0_i32_0 : i32, i32
  }
  func.func @transform_3(%arg0: i32) -> (i32, i32) {
    %c0_i32 = arith.constant 0 : i32
    %c0_i32_0 = arith.constant 0 : i32
    %c0_i32_1 = arith.constant 0 : i32
    return %c0_i32, %c0_i32_0 : i32, i32
  }
  func.func @transform_4(%arg0: i32) -> (i32, i32) {
    %c0_i32 = arith.constant 0 : i32
    %c0_i32_0 = arith.constant 0 : i32
    %c0_i32_1 = arith.constant 0 : i32
    return %c0_i32, %c0_i32_0 : i32, i32
  }
  func.func @transform_5(%arg0: i32) -> i32 {
    %c0_i32 = arith.constant 0 : i32
    %c0_i32_0 = arith.constant 0 : i32
    return %c0_i32 : i32
  }
  func.func @transform_6(%arg0: i32) -> (i32, i32, i32) {
    %c0_i32 = arith.constant 0 : i32
    %c0_i32_0 = arith.constant 0 : i32
    %c0_i32_1 = arith.constant 0 : i32
    return %arg0, %c0_i32, %c0_i32_0 : i32, i32, i32
  }
}

</mosaic_0001>

<bundles_post_ra>
// kernel: tpu_custom_call.1
= control target key start
LH: loop header
LB: loop body
LE: loop exit
PB: predicated region body
PF: predicated region fallthrough
CT: control target
= control target key end

     0   :  { %11 = vsyncpa [#allocation4], 0  ;;  %s1669_s0 = inlined_call_operand.vmem [shape: s32[1,8,128], index: 0, kind: input, shape index: {}]   ;;  %s1670_s1 = inlined_call_operand.vmem [shape: bf16[128,128], index: 1, kind: input, shape index: {}]   ;;  %s1671_s2 = inlined_call_operand.vmem [shape: bf16[128,128], index: 2, kind: input, shape index: {}]   ;;  %s1672_s3 = inlined_call_operand.vmem [shape: bf16[128,8], index: 3, kind: input, shape index: {}]   ;;  %s1673_s4 = inlined_call_operand.vmem [shape: bf16[128,8], index: 4, kind: input, shape index: {}]   ;;  %s1674_s5 = inlined_call_operand.vmem [shape: f32[2], index: 5, kind: input, shape index: {}]   ;;  %s1675_s6 = inlined_call_operand.hbm [shape: f32[1,1,128], index: 6, kind: output, shape index: {}]  }
   0x1   :  { %12 = vsyncpa [#allocation3], 0  ;;  %s29_s23 = sshll.u32 %s1674_s5, 4  ;;  %s30_s23 = int_to_ptr.vmem [resolvable:$true] %s29_s23 }
   0x2   :  { %s1236_s24 = scalar_lea.vmem %s30_s23, 16  ;;  %p1241_p1 = scmp.lt.s32.totalorder %s30_s23, %s30_s23 }
   0x3   :  { %p1237_p0 = scmp.ne.s32.totalorder %s30_s23, %s1236_s24  ;;  %p1242_p2 = scmp.lt.s32.totalorder %s1236_s24, %s1236_s24 }
   0x5   :  { %p1243_p3 = por %p1242_p2, %p1241_p1 }
   0x7   :  { %p1244_p4 = pnand %p1243_p3, %p1237_p0 }
   0x9   :  { %1247 = shalt.err (!%p1244_p4)
}
   0xa   :  { %s1272_s25 = smov [#allocation2]  }
   0xb   :  { %32 = dma.vmem_to_smem %s30_s23, 16, %s1272_s25, [#allocation4]  }
   0xc   :  { %1268 = dma.done.wait [#allocation4], 16  }
   0xd   :  { %1269 = vsyncadd [#allocation4], 4294967280 }
   0xe   :  { %36 = sfence }
   0xf   :  { %v1317_v0 = vld [vmem:[%s1669_s0] sm:$0xff]  ;;  %v39_v1 = vlaneseq  ;;  %v1273_v14 = vmov 1.0|1.0   ;;  %v1274_v28 = vmov 0.0   ;;  %v1204_v31 = vld [vmem:[%s1671_s2 + $0x8] sm:$0xff]   ;;  %v1206_v34 = vld [vmem:[%s1671_s2 + $0x10] sm:$0xff]  }
  0x10   :  { %v1202_v2 = vld [vmem:[%s1671_s2] sm:$0xff]   ;;  %v56_v5 = vshra.s32 %v1317_v0, 7  ;;  %v1205_v32 = vld [vmem:[%s1670_s1 + $0x8] sm:$0xff]   ;;  %v1207_v35 = vld [vmem:[%s1670_s1 + $0x10] sm:$0xff]   ;;  %v57_v62 = vand.u32 127, %v1317_v0 }
  0x11   :  { %v1203_v3 = vld [vmem:[%s1670_s1] sm:$0xff]   ;;  %v1325_v4 = vshrl.u32 %v39_v1, 7  ;;  %1112 = vmatprep.mubr.bf16.mxu0 %v1202_v2  ;;  %v1208_v36 = vld [vmem:[%s1671_s2 + $0x18] sm:$0xff]   ;;  %v1212_v40 = vld [vmem:[%s1671_s2 + $0x28] sm:$0xff]  }
  0x12   :  { %1144 = vmatprep.mubr.bf16.mxu1 %v1203_v3  ;;  %v1209_v37 = vld [vmem:[%s1670_s1 + $0x18] sm:$0xff]   ;;  %v1210_v38 = vld [vmem:[%s1671_s2 + $0x20] sm:$0xff]   ;;  %v1213_v41 = vld [vmem:[%s1670_s1 + $0x28] sm:$0xff]  }
  0x13   :  { %v1329_v6 = vadd.s32 112, %v1325_v4  ;;  %v1332_v7 = vadd.s32 120, %v1325_v4  ;;  %v60_v8 = vsub.s32 0, %v1325_v4  ;;  %v1336_v9 = vadd.s32 96, %v1325_v4  ;;  %v1211_v39 = vld [vmem:[%s1670_s1 + $0x20] sm:$0xff]   ;;  %v1214_v42 = vld [vmem:[%s1671_s2 + $0x30] sm:$0xff]  }
  0x14   :  { %v1339_v10 = vadd.s32 104, %v1325_v4  ;;  %v1346_v12 = vadd.s32 80, %v1325_v4  ;;  %v1349_v13 = vadd.s32 88, %v1325_v4  ;;  %v1366_v15 = vadd.s32 64, %v1325_v4  ;;  %v1215_v43 = vld [vmem:[%s1670_s1 + $0x30] sm:$0xff]   ;;  %v1216_v44 = vld [vmem:[%s1671_s2 + $0x38] sm:$0xff]  }
  0x15   :  { %v1343_v11 = vrot.slane %v56_v5, %v60_v8  ;;  %v1369_v16 = vadd.s32 72, %v1325_v4  ;;  %v1380_v17 = vadd.s32 48, %v1325_v4  ;;  %v1383_v18 = vadd.s32 56, %v1325_v4  ;;  %v1217_v45 = vld [vmem:[%s1670_s1 + $0x38] sm:$0xff]   ;;  %v1218_v46 = vld [vmem:[%s1673_s4] sm:$0xff]   ;;  %v1220_v48 = vld [vmem:[%s1673_s4 + $0x8] sm:$0xff]  }
  0x16   :  { %v1398_v20 = vadd.s32 32, %v1325_v4  ;;  %v1401_v21 = vadd.s32 40, %v1325_v4  ;;  %v1416_v23 = vadd.s32 16, %v1325_v4  ;;  %v1423_v24 = vadd.s32 24, %v1325_v4  ;;  %v1219_v47 = vld [vmem:[%s1672_s3] sm:$0xff]   ;;  %v1221_v49 = vld [vmem:[%s1672_s3 + $0x8] sm:$0xff]  }
  0x17   :  { %vm76_vm0 = vcmp.eq.s32.totalorder %v1329_v6, %v1343_v11  ;;  %vm77_vm1 = vcmp.eq.s32.totalorder %v1332_v7, %v1343_v11  ;;  %vm74_vm2 = vcmp.eq.s32.totalorder %v1336_v9, %v1343_v11  ;;  %vm75_vm3 = vcmp.eq.s32.totalorder %v1339_v10, %v1343_v11  ;;  %v1222_v50 = vld [vmem:[%s1673_s4 + $0x10] sm:$0xff]   ;;  %v1224_v52 = vld [vmem:[%s1673_s4 + $0x18] sm:$0xff]   ;;  %v1226_v54 = vld [vmem:[%s1673_s4 + $0x20] sm:$0xff]   ;;  %s1275_s2 = smov [#allocation5]  }
  0x18   :  { %vm972_vm4 = vmpackc.low %vm77_vm1, %vm76_vm0  ;;  %vm72_vm6 = vcmp.eq.s32.totalorder %v1346_v12, %v1343_v11  ;;  %vm73_vm7 = vcmp.eq.s32.totalorder %v1349_v13, %v1343_v11  ;;  %vm70_vm9 = vcmp.eq.s32.totalorder %v1366_v15, %v1343_v11  ;;  %vm71_vm10 = vcmp.eq.s32.totalorder %v1369_v16, %v1343_v11  ;;  %v1223_v51 = vld [vmem:[%s1672_s3 + $0x10] sm:$0xff]   ;;  %v1225_v53 = vld [vmem:[%s1672_s3 + $0x18] sm:$0xff]   ;;  %s939_s12 = sshll.u32 %s1275_s2, 4  ;;  %s940_s12 = int_to_ptr.vmem [resolvable:$true] %s939_s12 }
  0x19   :  { %1096 = vmatprep.subr.msk.bf16.mxu0 %vm972_vm4, %v1273_v14  ;;  %1128 = vmatprep.subr.msk.bf16.mxu1 %vm972_vm4, %v1273_v14  ;;  %vm974_vm5 = vmpackc.low %vm75_vm3, %vm74_vm2  ;;  %vm68_vm12 = vcmp.eq.s32.totalorder %v1380_v17, %v1343_v11  ;;  %vm69_vm13 = vcmp.eq.s32.totalorder %v1383_v18, %v1343_v11  ;;  %vm66_vm15 = vcmp.eq.s32.totalorder %v1398_v20, %v1343_v11  ;;  %v499_v25 = vsub.s32 1, %v1325_v4  ;;  %v1227_v55 = vld [vmem:[%s1672_s3 + $0x20] sm:$0xff]   ;;  %v1228_v56 = vld [vmem:[%s1673_s4 + $0x28] sm:$0xff]   ;;  %s1248_s1 = scalar_lea.vmem %s940_s12, 16  ;;  %s1252_s13 = scalar_lea.vmem %s940_s12, 32 }
  0x1a   :  { %1097 = vmatpush3.bf16.msk.msra.mxu0 %vm972_vm4, %v1273_v14  ;;  %1129 = vmatpush3.bf16.msk.msra.mxu1 %vm972_vm4, %v1273_v14  ;;  %vm976_vm8 = vmpackc.low %vm73_vm7, %vm72_vm6  ;;  %vm67_vm0 = vcmp.eq.s32.totalorder %v1401_v21, %v1343_v11  ;;  %vm64_vm2 = vcmp.eq.s32.totalorder %v1416_v23, %v1343_v11  ;;  %vm65_vm3 = vcmp.eq.s32.totalorder %v1423_v24, %v1343_v11  ;;  %v1443_v26 = vadd.s32 8, %v1325_v4  ;;  %v1229_v57 = vld [vmem:[%s1672_s3 + $0x28] sm:$0xff]   ;;  %v1230_v58 = vld [vmem:[%s1673_s4 + $0x30] sm:$0xff]   ;;  %p1249_p5 = scmp.ne.s32.totalorder %s940_s12, %s1248_s1  ;;  %p1253_p6 = scmp.lt.s32.totalorder %s940_s12, %s940_s12 }
  0x1b   :  { %1098 = vmatprep.subr.msk.bf16.mxu0 %vm974_vm5, %v1273_v14  ;;  %1130 = vmatprep.subr.msk.bf16.mxu1 %vm974_vm5, %v1273_v14  ;;  %vm1389_vm11 = vmpackc.low %vm71_vm10, %vm70_vm9  ;;  %v500_v27 = vrot.slane %v56_v5, %v499_v25  ;;  %vm602_vm9 = vcmask 1043456   ;;  %vm577_vm10 = vcmask 64512   ;;  %v1231_v59 = vld [vmem:[%s1672_s3 + $0x30] sm:$0xff]   ;;  %v1232_v60 = vld [vmem:[%s1673_s4 + $0x38] sm:$0xff]   ;;  %v1581_v5 = vrot.slane %v57_v62, %v60_v8  ;;  %s1045_s4 = sld [smem:[#allocation2 + $0x1]]  ;;  %p1254_p7 = scmp.lt.s32.totalorder %s1252_s13, %s1248_s1 }
  0x1c   :  { %vm1411_vm14 = vmpackc.low %vm69_vm13, %vm68_vm12  ;;  %vm63_vm6 = vcmp.eq.s32.totalorder %v1443_v26, %v1343_v11  ;;  %v1233_v61 = vld [vmem:[%s1672_s3 + $0x38] sm:$0xff]   ;;  %s922_s3 = sld [smem:[#allocation2]] }
  0x1d   :  { %vm982_vm1 = vmpackc.low %vm67_vm0, %vm66_vm15  ;;  %vm501_vm7 = vcmp.eq.s32.totalorder %v1325_v4, %v500_v27  ;;  %vm445_vm12 = vcmp.eq.s32.totalorder %v1443_v26, %v1581_v5  ;;  %vm446_vm13 = vcmp.eq.s32.totalorder %v1416_v23, %v1581_v5  ;;  %vm448_vm15 = vcmp.eq.s32.totalorder %v1398_v20, %v1581_v5  ;;  %p1255_p8 = por %p1254_p7, %p1253_p6 }
  0x1e   :  { %1099 = vmatpush3.bf16.msk.msra.mxu0 %vm974_vm5, %v1273_v14  ;;  %1131 = vmatpush3.bf16.msk.msra.mxu1 %vm974_vm5, %v1273_v14  ;;  %vm984_vm4 = vmpackc.low %vm65_vm3, %vm64_vm2  ;;  %vm62_vm5 = vcmp.eq.s32.totalorder %v1325_v4, %v1343_v11  ;;  %v1012_v29 = vsel %vm501_vm7, 1.0, %v1274_v28  ;;  %vm449_vm0 = vcmp.eq.s32.totalorder %v1401_v21, %v1581_v5  ;;  %vm451_vm2 = vcmp.eq.s32.totalorder %v1383_v18, %v1581_v5 }
  0x1f   :  { %1100 = vmatprep.subr.msk.bf16.mxu0 %vm976_vm8, %v1273_v14  ;;  %1132 = vmatprep.subr.msk.bf16.mxu1 %vm976_vm8, %v1273_v14  ;;  %v504_v30 = vpack.c.bf16 %v1012_v29, %v1012_v29  ;;  %vm452_vm3 = vcmp.eq.s32.totalorder %v1366_v15, %v1581_v5  ;;  %p1256_p9 = pnand %p1255_p8, %p1249_p5 }
  0x21   :  { %v604_v33 = vsel %vm602_vm9, %v504_v30, 0 }
  0x22   :  { %1101 = vmatpush3.bf16.msk.msra.mxu0 %vm976_vm8, %v1273_v14  ;;  %1133 = vmatpush3.bf16.msk.msra.mxu1 %vm976_vm8, %v1273_v14  ;;  %vm986_vm8 = vmpackc.low %vm63_vm6, %vm62_vm5  ;;  %vm454_vm5 = vcmp.eq.s32.totalorder %v1346_v12, %v1581_v5  ;;  %vm455_vm6 = vcmp.eq.s32.totalorder %v1349_v13, %v1581_v5 }
  0x23   :  { %1102 = vmatprep.subr.msk.bf16.mxu0 %vm1389_vm11, %v1273_v14  ;;  %1134 = vmatprep.subr.msk.bf16.mxu1 %vm1389_vm11, %v1273_v14 }
  0x26   :  { %1103 = vmatpush3.bf16.msk.msra.mxu0 %vm1389_vm11, %v1273_v14  ;;  %1135 = vmatpush3.bf16.msk.msra.mxu1 %vm1389_vm11, %v1273_v14  ;;  %vm444_vm11 = vcmp.eq.s32.totalorder %v1325_v4, %v1581_v5 }
  0x27   :  { %1104 = vmatprep.subr.msk.bf16.mxu0 %vm1411_vm14, %v1273_v14  ;;  %1136 = vmatprep.subr.msk.bf16.mxu1 %vm1411_vm14, %v1273_v14 }
  0x2a   :  { %1105 = vmatpush3.bf16.msk.msra.mxu0 %vm1411_vm14, %v1273_v14  ;;  %1137 = vmatpush3.bf16.msk.msra.mxu1 %vm1411_vm14, %v1273_v14  ;;  %vm447_vm14 = vcmp.eq.s32.totalorder %v1423_v24, %v1581_v5 }
  0x2b   :  { %1106 = vmatprep.subr.msk.bf16.mxu0 %vm982_vm1, %v1273_v14  ;;  %1138 = vmatprep.subr.msk.bf16.mxu1 %vm982_vm1, %v1273_v14 }
  0x2e   :  { %1107 = vmatpush3.bf16.msk.msra.mxu0 %vm982_vm1, %v1273_v14  ;;  %1139 = vmatpush3.bf16.msk.msra.mxu1 %vm982_vm1, %v1273_v14  ;;  %vm450_vm1 = vcmp.eq.s32.totalorder %v1380_v17, %v1581_v5 }
  0x2f   :  { %1108 = vmatprep.subr.msk.bf16.mxu0 %vm984_vm4, %v1273_v14  ;;  %1140 = vmatprep.subr.msk.bf16.mxu1 %vm984_vm4, %v1273_v14 }
  0x32   :  { %1109 = vmatpush3.bf16.msk.msra.mxu0 %vm984_vm4, %v1273_v14  ;;  %1141 = vmatpush3.bf16.msk.msra.mxu1 %vm984_vm4, %v1273_v14  ;;  %vm453_vm4 = vcmp.eq.s32.totalorder %v1369_v16, %v1581_v5 }
  0x33   :  { %1110 = vmatprep.subr.msk.bf16.mxu0 %vm986_vm8, %v1273_v14  ;;  %1142 = vmatprep.subr.msk.bf16.mxu1 %vm986_vm8, %v1273_v14 }
  0x36   :  { %1111 = vmatpush3.bf16.msk.msra.mxu0 %vm986_vm8, %v1273_v14  ;;  %1143 = vmatpush3.bf16.msk.msra.mxu1 %vm986_vm8, %v1273_v14 }
  0x37   :  { %1196 = vmatprep.subr.msk.bf16.mxu0 %vm602_vm9, %v504_v30  ;;  %1197 = vmatprep.subr.msk.bf16.mxu1 %vm602_vm9, %v504_v30 }
  0x39   :  { %1113 = vmatmul.mubr.bf16.vlgmr.msra.gmra.mxu0 %v1204_v31  ;;  %1145 = vmatmul.mubr.bf16.vlgmr.msra.gmra.mxu1 %v1205_v32 }
  0x3a   :  { %1161 = vmatpush3.bf16.msra.mxu0 %v604_v33  ;;  %1179 = vmatpush3.bf16.msra.mxu1 %v604_v33 }
  0x3b   :  { %1116 = vmatprep.mubr.bf16.mxu0 %v1206_v34  ;;  %1148 = vmatprep.mubr.bf16.mxu1 %v1207_v35 }
  0x41   :  { %1117 = vmatmul.mubr.bf16.gmra.mxu0 %v1208_v36  ;;  %1149 = vmatmul.mubr.bf16.gmra.mxu1 %v1209_v37 }
  0x42   :  { %1120 = vmatprep.mubr.bf16.mxu0 %v1210_v38  ;;  %1152 = vmatprep.mubr.bf16.mxu1 %v1211_v39 }
  0x49   :  { %1121 = vmatmul.mubr.bf16.gmra.mxu0 %v1212_v40  ;;  %1153 = vmatmul.mubr.bf16.gmra.mxu1 %v1213_v41 }
  0x4a   :  { %1124 = vmatprep.mubr.bf16.mxu0 %v1214_v42  ;;  %1156 = vmatprep.mubr.bf16.mxu1 %v1215_v43 }
  0x51   :  { %1125 = vmatmul.mubr.bf16.gmra.mxu0 %v1216_v44  ;;  %1157 = vmatmul.mubr.bf16.gmra.mxu1 %v1217_v45 }
  0x52   :  { %1162 = vmatprep.mubr.msk.bf16.mxu0 %vm577_vm10, %v1218_v46  ;;  %1180 = vmatprep.mubr.msk.bf16.mxu1 %vm577_vm10, %v1219_v47 }
  0x59   :  { %1163 = vmatmul.mubr.msk.bf16.vlgmr.msra.gmra.mxu0 %vm577_vm10, %v1220_v48  ;;  %1181 = vmatmul.mubr.msk.bf16.vlgmr.msra.gmra.mxu1 %vm577_vm10, %v1221_v49 }
  0x5a   :  { %1166 = vmatprep.mubr.msk.bf16.mxu0 %vm577_vm10, %v1222_v50  ;;  %1184 = vmatprep.mubr.msk.bf16.mxu1 %vm577_vm10, %v1223_v51 }
  0x61   :  { %1167 = vmatmul.mubr.msk.bf16.gmra.mxu0 %vm577_vm10, %v1224_v52  ;;  %1185 = vmatmul.mubr.msk.bf16.gmra.mxu1 %vm577_vm10, %v1225_v53 }
  0x62   :  { %1170 = vmatprep.mubr.msk.bf16.mxu0 %vm577_vm10, %v1226_v54  ;;  %1188 = vmatprep.mubr.msk.bf16.mxu1 %vm577_vm10, %v1227_v55 }
  0x69   :  { %1171 = vmatmul.mubr.msk.bf16.gmra.mxu0 %vm577_vm10, %v1228_v56  ;;  %1189 = vmatmul.mubr.msk.bf16.gmra.mxu1 %vm577_vm10, %v1229_v57 }
  0x6a   :  { %1174 = vmatprep.mubr.msk.bf16.mxu0 %vm577_vm10, %v1230_v58  ;;  %1192 = vmatprep.mubr.msk.bf16.mxu1 %vm577_vm10, %v1231_v59 }
  0x71   :  { %1175 = vmatmul.mubr.msk.bf16.gmra.mxu0 %vm577_vm10, %v1232_v60  ;;  %1193 = vmatmul.mubr.msk.bf16.gmra.mxu1 %vm577_vm10, %v1233_v61  ;;  %vm456_vm10 = vcmp.eq.s32.totalorder %v1336_v9, %v1581_v5 }
  0xf9   :  { %v1114_v63 = vpop.f32.mrf.mxu0  ;;  %v1146_v1 = vpop.f32.mrf.mxu1 }
  0xfa   :  { %v386_v28 = vadd.f32 %v1146_v1, %v1114_v63 }
  0xfb   :  { %v232_v2 = vpop.f32.mrf.mxu0  ;;  %v377_v3 = vpop.f32.mrf.mxu1 }
  0xfc   :  { %v378_v19 = vadd.f32 %v377_v3, %v232_v2  ;;  %v462_v37 = vsel %vm446_vm13, %v386_v28, 0.0 }
  0xfd   :  { %v1115_v11 = vpop.f32.mrf.mxu0  ;;  %v1147_v14 = vpop.f32.mrf.mxu1 }
  0xfe   :  { %v460_v8 = vsel %vm444_vm11, %v378_v19, 0.0  ;;  %v389_v32 = vadd.f32 %v1147_v14, %v1115_v11 }
  0xff   :  { %v235_v22 = vpop.f32.mrf.mxu0  ;;  %v380_v27 = vpop.f32.mrf.mxu1 }
 0x100   :  { %v381_v29 = vadd.f32 %v380_v27, %v235_v22  ;;  %v463_v42 = vsel %vm447_vm14, %v389_v32, 0.0 }
 0x101   :  { %v1118_v30 = vpop.f32.mrf.mxu0  ;;  %v1150_v31 = vpop.f32.mrf.mxu1 }
 0x102   :  { %v461_v33 = vsel %vm445_vm12, %v381_v29, 0.0  ;;  %v402_v51 = vadd.f32 %v1150_v31, %v1118_v30  ;;  %vm457_vm12 = vcmp.eq.s32.totalorder %v1339_v10, %v1581_v5 }
 0x103   :  { %v476_v34 = vadd.f32 %v461_v33, %v460_v8  ;;  %v248_v35 = vpop.f32.mrf.mxu0  ;;  %v393_v36 = vpop.f32.mrf.mxu1 }
 0x104   :  { %v394_v38 = vadd.f32 %v393_v36, %v248_v35  ;;  %v466_v58 = vsel %vm450_vm1, %v402_v51, 0.0 }
 0x105   :  { %v477_v39 = vadd.f32 %v476_v34, %v462_v37  ;;  %v1119_v40 = vpop.f32.mrf.mxu0  ;;  %v1151_v41 = vpop.f32.mrf.mxu1 }
 0x106   :  { %v464_v46 = vsel %vm448_vm15, %v394_v38, 0.0  ;;  %v405_v59 = vadd.f32 %v1151_v41, %v1119_v40  ;;  %v1617_v40 = vrot.slane %v57_v62, %v499_v25 }
 0x107   :  { %v478_v43 = vadd.f32 %v477_v39, %v463_v42  ;;  %v251_v44 = vpop.f32.mrf.mxu0  ;;  %v396_v45 = vpop.f32.mrf.mxu1 }
 0x108   :  { %v397_v47 = vadd.f32 %v396_v45, %v251_v44  ;;  %v467_v3 = vsel %vm451_vm2, %v405_v59, 0.0  ;;  %vm868_vm7 = vcmp.eq.s32.totalorder %v1325_v4, %v1617_v40  ;;  %vm869_vm8 = vcmp.eq.s32.totalorder %v1443_v26, %v1617_v40 }
 0x109   :  { %v479_v48 = vadd.f32 %v478_v43, %v464_v46  ;;  %v1122_v49 = vpop.f32.mrf.mxu0  ;;  %v1154_v50 = vpop.f32.mrf.mxu1  ;;  %vm870_vm9 = vcmp.eq.s32.totalorder %v1416_v23, %v1617_v40  ;;  %vm871_vm11 = vcmp.eq.s32.totalorder %v1423_v24, %v1617_v40  ;;  %vm872_vm13 = vcmp.eq.s32.totalorder %v1398_v20, %v1617_v40 }
 0x10a   :  { %v465_v52 = vsel %vm449_vm0, %v397_v47, 0.0  ;;  %v418_v36 = vadd.f32 %v1154_v50, %v1122_v49  ;;  %vm873_vm14 = vcmp.eq.s32.totalorder %v1401_v21, %v1617_v40  ;;  %vm874_vm15 = vcmp.eq.s32.totalorder %v1380_v17, %v1617_v40 }
 0x10b   :  { %v480_v53 = vadd.f32 %v479_v48, %v465_v52  ;;  %v264_v54 = vpop.f32.mrf.mxu0  ;;  %v409_v55 = vpop.f32.mrf.mxu1  ;;  %vm458_vm0 = vcmp.eq.s32.totalorder %v1329_v6, %v1581_v5  ;;  %vm875_vm1 = vcmp.eq.s32.totalorder %v1383_v18, %v1617_v40  ;;  %vm876_vm2 = vcmp.eq.s32.totalorder %v1366_v15, %v1617_v40 }
 0x10c   :  { %v410_v11 = vadd.f32 %v409_v55, %v264_v54  ;;  %v470_v44 = vsel %vm454_vm5, %v418_v36, 0.0  ;;  %vm878_vm5 = vcmp.eq.s32.totalorder %v1346_v12, %v1617_v40 }
 0x10d   :  { %v1123_v56 = vpop.f32.mrf.mxu0  ;;  %v1155_v57 = vpop.f32.mrf.mxu1  ;;  %v481_v60 = vadd.f32 %v480_v53, %v466_v58 }
 0x10e   :  { %v468_v30 = vsel %vm452_vm3, %v410_v11, 0.0  ;;  %v421_v41 = vadd.f32 %v1155_v57, %v1123_v56  ;;  %vm459_vm3 = vcmp.eq.s32.totalorder %v1332_v7, %v1581_v5 }
 0x10f   :  { %v267_v61 = vpop.f32.mrf.mxu0  ;;  %v412_v63 = vpop.f32.mrf.mxu1  ;;  %v482_v14 = vadd.f32 %v481_v60, %v467_v3 }
 0x110   :  { %v413_v27 = vadd.f32 %v412_v63, %v267_v61  ;;  %v471_v62 = vsel %vm455_vm6, %v421_v41, 0.0  ;;  %vm879_vm6 = vcmp.eq.s32.totalorder %v1349_v13, %v1617_v40 }
 0x111   :  { %v1599_v1 = vpop.f32.mrf.mxu0  ;;  %v1601_v2 = vpop.f32.mrf.mxu1  ;;  %v483_v31 = vadd.f32 %v482_v14, %v468_v30 }
 0x112   :  { %v469_v33 = vsel %vm453_vm4, %v413_v27, 0.0  ;;  %vm877_vm4 = vcmp.eq.s32.totalorder %v1369_v16, %v1617_v40 }
 0x113   :  { %v280_v19 = vpop.f32.mrf.mxu0  ;;  %v425_v22 = vpop.f32.mrf.mxu1  ;;  %v484_v37 = vadd.f32 %v483_v31, %v469_v33 }
 0x114   :  { %v426_v52 = vadd.f32 %v425_v22, %v280_v19 }
 0x115   :  { %v1607_v28 = vpop.f32.mrf.mxu0  ;;  %v1609_v29 = vpop.f32.mrf.mxu1  ;;  %v485_v46 = vadd.f32 %v484_v37, %v470_v44 }
 0x116   :  { %v472_v3 = vsel %vm456_vm10, %v426_v52, 0.0  ;;  %v437_v44 = vadd.f32 %v1609_v29, %v1607_v28  ;;  %vm883_vm10 = vcmp.eq.s32.totalorder %v1332_v7, %v1617_v40 }
 0x117   :  { %v283_v8 = vpop.f32.mrf.mxu0  ;;  %v428_v32 = vpop.f32.mrf.mxu1  ;;  %v486_v4 = vadd.f32 %v485_v46, %v471_v62 }
 0x118   :  { %v429_v58 = vadd.f32 %v428_v32, %v283_v8  ;;  %v475_v29 = vsel %vm459_vm3, %v437_v44, 0.0 }
 0x119   :  { %v1164_v34 = vpop.f32.mrf.mxu0  ;;  %v1182_v35 = vpop.f32.mrf.mxu1  ;;  %v487_v14 = vadd.f32 %v486_v4, %v472_v3 }
 0x11a   :  { %v810_v49 = vadd.f32 %v1182_v35, %v1164_v34  ;;  %v473_v27 = vsel %vm457_vm12, %v429_v58, 0.0  ;;  %v434_v34 = vadd.f32 %v1601_v2, %v1599_v1 }
 0x11b   :  { %v640_v38 = vpop.f32.mrf.mxu0  ;;  %v801_v39 = vpop.f32.mrf.mxu1  ;;  %v488_v37 = vadd.f32 %v487_v14, %v473_v27 }
 0x11c   :  { %v802_v45 = vadd.f32 %v801_v39, %v640_v38  ;;  %v886_v59 = vsel %vm870_vm9, %v810_v49, 0.0  ;;  %v474_v2 = vsel %vm458_vm0, %v434_v34, 0.0  ;;  %vm882_vm9 = vcmp.eq.s32.totalorder %v1329_v6, %v1617_v40 }
 0x11d   :  { %v1165_v42 = vpop.f32.mrf.mxu0  ;;  %v1183_v43 = vpop.f32.mrf.mxu1  ;;  %v489_v18 = vadd.f32 %v488_v37, %v474_v2 }
 0x11e   :  { %v884_v53 = vsel %vm868_vm7, %v802_v45, 0.0  ;;  %v813_v54 = vadd.f32 %v1183_v43, %v1165_v42  ;;  %vm880_vm7 = vcmp.eq.s32.totalorder %v1336_v9, %v1617_v40 }
 0x11f   :  { %v643_v47 = vpop.f32.mrf.mxu0  ;;  %v804_v48 = vpop.f32.mrf.mxu1  ;;  %v490_v5 = vadd.f32 %v489_v18, %v475_v29 }
 0x120   :  { %v805_v25 = vadd.f32 %v804_v48, %v643_v47  ;;  %v887_v11 = vsel %vm871_vm11, %v813_v54, 0.0  ;;  %vm921_vm11 = vcmp.eq.s32.totalorder %v1317_v0, 0 }
 0x121   :  { %v1168_v50 = vpop.f32.mrf.mxu0  ;;  %v1186_v51 = vpop.f32.mrf.mxu1  ;;  %v491_v58 = vrot.slane %v490_v5, 4 }
 0x122   :  { %v885_v55 = vsel %vm869_vm8, %v805_v25, 0.0  ;;  %v826_v30 = vadd.f32 %v1186_v51, %v1168_v50  ;;  %vm881_vm8 = vcmp.eq.s32.totalorder %v1339_v10, %v1617_v40 }
 0x123   :  { %v900_v26 = vadd.f32 %v885_v55, %v884_v53  ;;  %v656_v56 = vpop.f32.mrf.mxu0  ;;  %v817_v57 = vpop.f32.mrf.mxu1  ;;  %v492_v9 = vadd.f32 %v491_v58, %v490_v5 }
 0x124   :  { %v818_v60 = vadd.f32 %v817_v57, %v656_v56  ;;  %v890_v41 = vsel %vm874_vm15, %v826_v30, 0.0 }
 0x125   :  { %v901_v23 = vadd.f32 %v900_v26, %v886_v59  ;;  %v1169_v61 = vpop.f32.mrf.mxu0  ;;  %v1187_v63 = vpop.f32.mrf.mxu1  ;;  %v493_v30 = vrot.slane %v492_v9, 2 }
 0x126   :  { %v888_v31 = vsel %vm872_vm13, %v818_v60, 0.0  ;;  %v829_v35 = vadd.f32 %v1187_v63, %v1169_v61 }
 0x127   :  { %v902_v19 = vadd.f32 %v901_v23, %v887_v11  ;;  %v659_v24 = vpop.f32.mrf.mxu0  ;;  %v820_v22 = vpop.f32.mrf.mxu1 }
 0x128   :  { %v821_v8 = vadd.f32 %v820_v22, %v659_v24  ;;  %v891_v45 = vsel %vm875_vm1, %v829_v35, 0.0  ;;  %v924_v35 = vstv %s922_s3 }
 0x129   :  { %v903_v32 = vadd.f32 %v902_v19, %v888_v31  ;;  %v1172_v20 = vpop.f32.mrf.mxu0  ;;  %v1190_v33 = vpop.f32.mrf.mxu1 }
 0x12a   :  { %v889_v36 = vsel %vm873_vm14, %v821_v8, 0.0  ;;  %v842_v49 = vadd.f32 %v1190_v33, %v1172_v20 }
 0x12b   :  { %v904_v21 = vadd.f32 %v903_v32, %v889_v36  ;;  %v672_v38 = vpop.f32.mrf.mxu0  ;;  %v833_v39 = vpop.f32.mrf.mxu1  ;;  %v494_v32 = vadd.f32 %v493_v30, %v492_v9  ;;  %v925_v36 = vstv %s1045_s4 }
 0x12c   :  { %v834_v17 = vadd.f32 %v833_v39, %v672_v38  ;;  %v894_v16 = vsel %vm878_vm5, %v842_v49, 0.0  ;;  %v926_v37 = vsel %vm921_vm11, %v924_v35, %v925_v36 }
 0x12d   :  { %v905_v42 = vadd.f32 %v904_v21, %v890_v41  ;;  %v1173_v43 = vpop.f32.mrf.mxu0  ;;  %v1191_v1 = vpop.f32.mrf.mxu1  ;;  %v495_v6 = vrot.slane %v494_v32, 1 }
 0x12e   :  { %v892_v25 = vsel %vm876_vm2, %v834_v17, 0.0  ;;  %v845_v51 = vadd.f32 %v1191_v1, %v1173_v43 }
 0x12f   :  { %v906_v46 = vadd.f32 %v905_v42, %v891_v45  ;;  %v675_v47 = vpop.f32.mrf.mxu0  ;;  %v836_v48 = vpop.f32.mrf.mxu1  ;;  %v496_v7 = vadd.f32 %v495_v6, %v494_v32 }
 0x130   :  { %v837_v15 = vadd.f32 %v836_v48, %v675_v47  ;;  %v895_v57 = vsel %vm879_vm6, %v845_v51, 0.0 }
 0x131   :  { %v907_v62 = vadd.f32 %v906_v46, %v892_v25  ;;  %v1176_v50 = vpop.f32.mrf.mxu0  ;;  %v1194_v28 = vpop.f32.mrf.mxu1 }
 0x132   :  { %v893_v52 = vsel %vm877_vm4, %v837_v15, 0.0  ;;  %v858_v13 = vadd.f32 %v1194_v28, %v1176_v50 }
 0x133   :  { %v908_v53 = vadd.f32 %v907_v62, %v893_v52  ;;  %v688_v54 = vpop.f32.mrf.mxu0  ;;  %v849_v55 = vpop.f32.mrf.mxu1 }
 0x134   :  { %v850_v4 = vadd.f32 %v849_v55, %v688_v54  ;;  %v898_v24 = vsel %vm882_vm9, %v858_v13, 0.0 }
 0x135   :  { %v909_v26 = vadd.f32 %v908_v53, %v894_v16  ;;  %v1177_v12 = vpop.f32.mrf.mxu0  ;;  %v1195_v56 = vpop.f32.mrf.mxu1 }
 0x136   :  { %v896_v61 = vsel %vm880_vm7, %v850_v4, 0.0  ;;  %v861_v11 = vadd.f32 %v1195_v56, %v1177_v12 }
 0x137   :  { %v910_v59 = vadd.f32 %v909_v26, %v895_v57  ;;  %v691_v60 = vpop.f32.mrf.mxu0  ;;  %v852_v23 = vpop.f32.mrf.mxu1 }
 0x138   :  { %v853_v63 = vadd.f32 %v852_v23, %v691_v60  ;;  %v899_v27 = vsel %vm883_vm10, %v861_v11, 0.0 }
 0x139   :  { %v911_v3 = vadd.f32 %v910_v59, %v896_v61 }
 0x13a   :  { %v897_v14 = vsel %vm881_vm8, %v853_v63, 0.0 }
 0x13b   :  { %v912_v19 = vadd.f32 %v911_v3, %v897_v14 }
 0x13d   :  { %v913_v22 = vadd.f32 %v912_v19, %v898_v24 }
 0x13f   :  { %v914_v31 = vadd.f32 %v913_v22, %v899_v27 }
 0x141   :  { %v915_v10 = vrot.slane %v914_v31, 4 }
 0x143   :  { %v916_v8 = vadd.f32 %v915_v10, %v914_v31 }
 0x145   :  { %v917_v20 = vrot.slane %v916_v8, 2 }
 0x147   :  { %v918_v33 = vadd.f32 %v917_v20, %v916_v8 }
 0x149   :  { %v919_v34 = vrot.slane %v918_v33, 1 }
 0x14b   :  { %v920_v40 = vadd.f32 %v919_v34, %v918_v33 }
 0x14d   :  { %v927_v21 = vadd.f32 %v920_v40, %v496_v7 }
 0x14f   :  { %v928_v38 = vadd.f32 %v927_v21, %v926_v37 }
 0x151   :  { %v929_v39 = vmul.f32 0.2, %v928_v38 }
 0x153   :  { %v930_v41 = vmul.f32 1.442695, %v929_v39 }
 0x155   :  { %1234 = vpow2.f32 %v930_v41 }
 0x162   :  { %v1235_v17 = vpop.eup %1234 }
 0x163   :  { %932 = vst [vmem:[#allocation5 - $0x2] sm:$0x4] %v1235_v17 }
 0x164   :  { %1259 = shalt.err (!%p1256_p9)
}
 0x165   :  { %942 = dma.vmem_to_hbm [thread:$0]  %s940_s12, 16, %s1675_s6, [#allocation3]  }
 0x166   :  { %1270 = dma.done.wait [#allocation3], 16  }
 0x167   :  { %1271 = vsyncadd [#allocation3], 4294967280 }
 0x168   :  { %946 = vsyncpa [#allocation3], 1 }
 0x169   :  { %947 = vsyncpa [#allocation4], 1 }

</bundles_post_ra>
